<compile_context>
chip_gen: v6e
topology: v6e:2x2x1
jax: 0.10.0
libtpu: 0.0.40
codegen_flags: <defaults>
</compile_context>

<pallas_src>
import math

import jax
import jax.numpy as jnp
from jax.experimental import pallas as pl
from jax.experimental.pallas import tpu as pltpu

STATE_SIZE = 26
ACTION_SIZE = 20
HIDDEN_SIZE = 128
IN_CAT = STATE_SIZE + ACTION_SIZE          # 46
FUSED_OUT = 2 * HIDDEN_SIZE                # 256  ->  [x@W1 | x0@W2a]
MAX_TILE_B = 512                           # batch rows per grid step


def critic_kernel(xc_ref, wc_ref, b1_ref, w2h_ref, b2_ref, w3_ref, b3_ref,
                  out_ref):
    # ---- fused layer: one MXU pass over the block-diagonal weight --------
    # fused = [ x @ W1 | x0 @ W2a ]   (f32 accumulation)
    fused = jnp.dot(xc_ref[...], wc_ref[...],
                    preferred_element_type=jnp.float32)
    h = jnp.maximum(fused[:, :HIDDEN_SIZE] + b1_ref[...], 0.0)   # relu(d1)
    z_a = fused[:, HIDDEN_SIZE:]                                 # x0 @ W2a

    # ---- layer l: relu(h @ W2h + x0 @ W2a + b2) ---------------------------
    z = jnp.dot(h.astype(jnp.bfloat16), w2h_ref[...],
                preferred_element_type=jnp.float32)
    h2 = jnp.maximum(z + z_a + b2_ref[...], 0.0)

    # ---- value head: VPU multiply + lane reduction (no N=1 MXU matmul) ----
    v = jnp.sum(h2 * w3_ref[...], axis=-1, keepdims=True)
    out_ref[...] = (v + b3_ref[0, 0]).astype(out_ref.dtype)


def critic_forward(x, x0, params):
    (wc, b1, w2h, b2, w3_row, b3) = params
    B = x.shape[0]

    # Lane-dense merged input stream, bf16 for HBM/VMEM traffic + MXU rate.
    xc = jnp.concatenate([x, x0], axis=-1).astype(jnp.bfloat16)

    # Batch tile: big enough to amortize per-step overhead, rounded to the
    # 8-row sublane tile; shrinks for tiny demo batches.
    tile_b = min(MAX_TILE_B, max(8, ((B + 7) // 8) * 8))
    grid = (pl.cdiv(B, tile_b),)

    weight_bytes = (wc.size + w2h.size) * 2 + (b1.size + b2.size + w3_row.size + b3.size) * 4
    cost = pl.CostEstimate(
        flops=2 * B * (IN_CAT * FUSED_OUT + HIDDEN_SIZE * HIDDEN_SIZE)
              + 2 * B * HIDDEN_SIZE,
        transcendentals=0,
        bytes_accessed=B * IN_CAT * 2 + B * 4 + weight_bytes,
    )

    return pl.pallas_call(
        critic_kernel,
        out_shape=jax.ShapeDtypeStruct((B, 1), jnp.float32),
        grid=grid,
        in_specs=[
            pl.BlockSpec((tile_b, IN_CAT), lambda i: (i, 0)),          # xc
            pl.BlockSpec((IN_CAT, FUSED_OUT), lambda i: (0, 0)),       # wc
            pl.BlockSpec((1, HIDDEN_SIZE), lambda i: (0, 0)),          # b1
            pl.BlockSpec((HIDDEN_SIZE, HIDDEN_SIZE), lambda i: (0, 0)),  # w2h
            pl.BlockSpec((1, HIDDEN_SIZE), lambda i: (0, 0)),          # b2
            pl.BlockSpec((1, HIDDEN_SIZE), lambda i: (0, 0)),          # w3 row
            pl.BlockSpec(memory_space=pltpu.MemorySpace.SMEM),         # b3
        ],
        out_specs=pl.BlockSpec((tile_b, 1), lambda i: (i, 0)),
        compiler_params=pltpu.CompilerParams(
            dimension_semantics=("parallel",),
            vmem_limit_bytes=32 * 1024 * 1024,
        ),
        cost_estimate=cost,
    )(xc, wc, b1, w2h, b2, w3_row, b3)


def init_params(key):
    """torch.nn.Linear-style init (uniform +/- 1/sqrt(fan_in)).

    Returns kernel-layout params:
      wc     (46, 256) bf16   block-diag [[W1, 0], [0, W2a]]
      b1     (1, 128)  f32
      w2h    (128,128) bf16
      b2     (1, 128)  f32
      w3_row (1, 128)  f32    (W3 transposed to a row for the VPU head)
      b3     (1, 1)    f32    (SMEM scalar)
    """
    ks = jax.random.split(key, 6)

    def lin(kw, kb, fan_in, fan_out):
        bound = 1.0 / math.sqrt(fan_in)
        w = jax.random.uniform(kw, (fan_in, fan_out), jnp.float32, -bound, bound)
        b = jax.random.uniform(kb, (1, fan_out), jnp.float32, -bound, bound)
        return w, b

    w1, b1 = lin(ks[0], ks[1], STATE_SIZE, HIDDEN_SIZE)
    w2, b2 = lin(ks[2], ks[3], HIDDEN_SIZE + ACTION_SIZE, HIDDEN_SIZE)
    w3, b3 = lin(ks[4], ks[5], HIDDEN_SIZE, 1)

    w2h = w2[:HIDDEN_SIZE, :]        # (128, 128)
    w2a = w2[HIDDEN_SIZE:, :]        # (20, 128)

    wc = jnp.zeros((IN_CAT, FUSED_OUT), jnp.float32)
    wc = wc.at[:STATE_SIZE, :HIDDEN_SIZE].set(w1)
    wc = wc.at[STATE_SIZE:, HIDDEN_SIZE:].set(w2a)

    return (wc.astype(jnp.bfloat16), b1, w2h.astype(jnp.bfloat16), b2,
            w3.T, b3.reshape(1, 1))


def reference_forward(x, x0, params):
    """Pure-JAX reference mirroring the kernel's bf16/f32 dtype path."""
    (wc, b1, w2h, b2, w3_row, b3) = params
    xc = jnp.concatenate([x, x0], axis=-1).astype(jnp.bfloat16).astype(jnp.float32)
    fused = xc @ wc.astype(jnp.float32)
    h = jnp.maximum(fused[:, :HIDDEN_SIZE] + b1, 0.0)
    z_a = fused[:, HIDDEN_SIZE:]
    z = h.astype(jnp.bfloat16).astype(jnp.float32) @ w2h.astype(jnp.float32)
    h2 = jnp.maximum(z + z_a + b2, 0.0)
    return jnp.sum(h2 * w3_row, axis=-1, keepdims=True) + b3[0, 0]


if __name__ == "__main__":
    key = jax.random.PRNGKey(0)
    k_params, k_x, k_x0 = jax.random.split(key, 3)

    # TODO(synk): at tiny batch sizes the pallas_call launch overhead dominates;
    # in the real PPO update this should be called on large stacked batches.
    B = 64
    params = init_params(k_params)
    x = jax.random.normal(k_x, (B, STATE_SIZE), jnp.float32)
    x0 = jax.random.normal(k_x0, (B, ACTION_SIZE), jnp.float32)

    out = critic_forward(x, x0, params)
    out = jax.block_until_ready(out)

    ref = reference_forward(x, x0, params)
    assert out.shape == (B, 1)
    assert jnp.allclose(out, ref, atol=1e-3, rtol=1e-3), "mismatch vs JAX reference"

    print("KERNEL_OK")
</pallas_src>

<mosaic_0001>
module attributes {stable_mosaic.version = 11 : i64} {
  func.func @critic_kernel(%arg0: i32, %arg1: memref<64x46xbf16, #tpu.memory_space<vmem>>, %arg2: memref<46x256xbf16, #tpu.memory_space<vmem>>, %arg3: memref<1x128xf32, #tpu.memory_space<vmem>>, %arg4: memref<128x128xbf16, #tpu.memory_space<vmem>>, %arg5: memref<1x128xf32, #tpu.memory_space<vmem>>, %arg6: memref<1x128xf32, #tpu.memory_space<vmem>>, %arg7: memref<1x1xf32, #tpu.memory_space<smem>>, %arg8: memref<64x1xf32, #tpu.memory_space<vmem>>) attributes {dimension_semantics = [#tpu.dimension_semantics<parallel>], iteration_bounds = array<i64: 1>, scalar_prefetch = 0 : i64, scratch_operands = 0 : i64, tpu.core_type = #tpu.core_type<tc>, window_params = [{transform_indices = @transform_0, window_bounds = array<i64: 64, 46>}, {pipeline_mode = #tpu.pipeline_mode<synchronous>, transform_indices = @transform_1, window_bounds = array<i64: 46, 256>}, {pipeline_mode = #tpu.pipeline_mode<synchronous>, transform_indices = @transform_2, window_bounds = array<i64: 1, 128>}, {pipeline_mode = #tpu.pipeline_mode<synchronous>, transform_indices = @transform_3, window_bounds = array<i64: 128, 128>}, {pipeline_mode = #tpu.pipeline_mode<synchronous>, transform_indices = @transform_4, window_bounds = array<i64: 1, 128>}, {pipeline_mode = #tpu.pipeline_mode<synchronous>, transform_indices = @transform_5, window_bounds = array<i64: 1, 128>}, {transform_indices = @transform_6, window_bounds = array<i64: 1, 1>}, {transform_indices = @transform_7, window_bounds = array<i64: 64, 1>}]} {
    %c0 = arith.constant 0 : index
    %c0_0 = arith.constant 0 : index
    %0 = vector.load %arg1[%c0, %c0_0] : memref<64x46xbf16, #tpu.memory_space<vmem>>, vector<64x46xbf16>
    %c0_1 = arith.constant 0 : index
    %c0_2 = arith.constant 0 : index
    %1 = vector.load %arg2[%c0_1, %c0_2] : memref<46x256xbf16, #tpu.memory_space<vmem>>, vector<46x256xbf16>
    %cst = arith.constant dense<0.000000e+00> : vector<64x256xf32>
    %2 = tpu.matmul %0, %1, %cst {dimension_numbers = #tpu.dot_dimension_numbers<[1], [0], [0], [1], [0, 0, 1, 1], [], []>} : vector<64x46xbf16>, vector<46x256xbf16>, vector<64x256xf32> -> vector<64x256xf32>
    %3 = vector.extract_strided_slice %2 {offsets = [0, 0], sizes = [64, 128], strides = [1, 1]} : vector<64x256xf32> to vector<64x128xf32>
    %c0_3 = arith.constant 0 : index
    %c0_4 = arith.constant 0 : index
    %4 = vector.load %arg3[%c0_3, %c0_4] : memref<1x128xf32, #tpu.memory_space<vmem>>, vector<1x128xf32>
    %5 = vector.broadcast %4 : vector<1x128xf32> to vector<64x128xf32>
    %6 = arith.addf %3, %5 : vector<64x128xf32>
    %cst_5 = arith.constant 0.000000e+00 : f32
    %7 = vector.broadcast %cst_5 : f32 to vector<64x128xf32>
    %8 = arith.maximumf %6, %7 : vector<64x128xf32>
    %9 = vector.extract_strided_slice %2 {offsets = [0, 128], sizes = [64, 128], strides = [1, 1]} : vector<64x256xf32> to vector<64x128xf32>
    %10 = arith.truncf %8 : vector<64x128xf32> to vector<64x128xbf16>
    %c0_6 = arith.constant 0 : index
    %c0_7 = arith.constant 0 : index
    %11 = vector.load %arg4[%c0_6, %c0_7] : memref<128x128xbf16, #tpu.memory_space<vmem>>, vector<128x128xbf16>
    %cst_8 = arith.constant dense<0.000000e+00> : vector<64x128xf32>
    %12 = tpu.matmul %10, %11, %cst_8 {dimension_numbers = #tpu.dot_dimension_numbers<[1], [0], [0], [1], [0, 0, 1, 1], [], []>} : vector<64x128xbf16>, vector<128x128xbf16>, vector<64x128xf32> -> vector<64x128xf32>
    %13 = arith.addf %12, %9 : vector<64x128xf32>
    %c0_9 = arith.constant 0 : index
    %c0_10 = arith.constant 0 : index
    %14 = vector.load %arg5[%c0_9, %c0_10] : memref<1x128xf32, #tpu.memory_space<vmem>>, vector<1x128xf32>
    %15 = vector.broadcast %14 : vector<1x128xf32> to vector<64x128xf32>
    %16 = arith.addf %13, %15 : vector<64x128xf32>
    %cst_11 = arith.constant 0.000000e+00 : f32
    %17 = vector.broadcast %cst_11 : f32 to vector<64x128xf32>
    %18 = arith.maximumf %16, %17 : vector<64x128xf32>
    %c0_12 = arith.constant 0 : index
    %c0_13 = arith.constant 0 : index
    %19 = vector.load %arg6[%c0_12, %c0_13] : memref<1x128xf32, #tpu.memory_space<vmem>>, vector<1x128xf32>
    %20 = vector.broadcast %19 : vector<1x128xf32> to vector<64x128xf32>
    %21 = arith.mulf %18, %20 : vector<64x128xf32>
    %cst_14 = arith.constant dense<0.000000e+00> : vector<64xf32>
    %22 = vector.multi_reduction <add>, %21, %cst_14 [1] : vector<64x128xf32> to vector<64xf32>
    %23 = vector.shape_cast %22 : vector<64xf32> to vector<64x1xf32>
    %c0_15 = arith.constant 0 : index
    %c0_16 = arith.constant 0 : index
    %24 = memref.load %arg7[%c0_15, %c0_16] : memref<1x1xf32, #tpu.memory_space<smem>>
    %25 = vector.broadcast %24 : f32 to vector<64x1xf32>
    %26 = arith.addf %23, %25 : vector<64x1xf32>
    %c0_17 = arith.constant 0 : index
    %c0_18 = arith.constant 0 : index
    %27 = vector.load %arg8[%c0_17, %c0_18] : memref<64x1xf32, #tpu.memory_space<vmem>>, vector<64x1xf32>
    tpu.vector_store %arg8[%c0_17, %c0_18], %26 {strides = array<i32>} : memref<64x1xf32, #tpu.memory_space<vmem>>, vector<64x1xf32>,
    return
  }
  func.func @transform_0(%arg0: i32) -> (i32, i32) {
    %c0_i32 = arith.constant 0 : i32
    %c0_i32_0 = arith.constant 0 : i32
    return %arg0, %c0_i32 : i32, i32
  }
  func.func @transform_1(%arg0: i32) -> (i32, i32) {
    %c0_i32 = arith.constant 0 : i32
    %c0_i32_0 = arith.constant 0 : i32
    %c0_i32_1 = arith.constant 0 : i32
    return %c0_i32, %c0_i32_0 : i32, i32
  }
  func.func @transform_2(%arg0: i32) -> (i32, i32) {
    %c0_i32 = arith.constant 0 : i32
    %c0_i32_0 = arith.constant 0 : i32
    %c0_i32_1 = arith.constant 0 : i32
    return %c0_i32, %c0_i32_0 : i32, i32
  }
  func.func @transform_3(%arg0: i32) -> (i32, i32) {
    %c0_i32 = arith.constant 0 : i32
    %c0_i32_0 = arith.constant 0 : i32
    %c0_i32_1 = arith.constant 0 : i32
    return %c0_i32, %c0_i32_0 : i32, i32
  }
  func.func @transform_4(%arg0: i32) -> (i32, i32) {
    %c0_i32 = arith.constant 0 : i32
    %c0_i32_0 = arith.constant 0 : i32
    %c0_i32_1 = arith.constant 0 : i32
    return %c0_i32, %c0_i32_0 : i32, i32
  }
  func.func @transform_5(%arg0: i32) -> (i32, i32) {
    %c0_i32 = arith.constant 0 : i32
    %c0_i32_0 = arith.constant 0 : i32
    %c0_i32_1 = arith.constant 0 : i32
    return %c0_i32, %c0_i32_0 : i32, i32
  }
  func.func @transform_6(%arg0: i32) -> (i32, i32) {
    %c0_i32 = arith.constant 0 : i32
    %c0_i32_0 = arith.constant 0 : i32
    %c0_i32_1 = arith.constant 0 : i32
    return %c0_i32, %c0_i32_0 : i32, i32
  }
  func.func @transform_7(%arg0: i32) -> (i32, i32) {
    %c0_i32 = arith.constant 0 : i32
    %c0_i32_0 = arith.constant 0 : i32
    return %arg0, %c0_i32 : i32, i32
  }
}

</mosaic_0001>

<bundles_post_ra>
// kernel: tpu_custom_call.1
= control target key start
LH: loop header
LB: loop body
LE: loop exit
PB: predicated region body
PF: predicated region fallthrough
CT: control target
= control target key end

     0   :  { %13 = vsyncpa [#allocation4], 0  ;;  %s540_s24 = smov [#allocation3]   ;;  %s665_s0 = inlined_call_operand.vmem [shape: bf16[64,46], index: 0, kind: input, shape index: {}]   ;;  %s666_s1 = inlined_call_operand.vmem [shape: bf16[46,256], index: 1, kind: input, shape index: {}]   ;;  %s667_s2 = inlined_call_operand.vmem [shape: f32[1,128], index: 2, kind: input, shape index: {}]   ;;  %s668_s3 = inlined_call_operand.hbm [shape: bf16[128,128], index: 3, kind: input, shape index: {}]   ;;  %s669_s4 = inlined_call_operand.vmem [shape: f32[1,128], index: 4, kind: input, shape index: {}]   ;;  %s670_s5 = inlined_call_operand.vmem [shape: f32[1,128], index: 5, kind: input, shape index: {}]   ;;  %s671_s6 = inlined_call_operand.<no memory space> [shape: f32[1,1], index: 6, kind: input, shape index: {}]   ;;  %s672_s7 = inlined_call_operand.vmem [shape: f32[64,1], index: 7, kind: output, shape index: {}]  }
   0x1   :  { %s25_s25 = sshll.u32 %s540_s24, 4  ;;  %s26_s25 = int_to_ptr.vmem [resolvable:$true] %s25_s25 }
   0x2   :  { %s526_s26 = scalar_lea.vmem %s26_s25, 1024  ;;  %p531_p1 = scmp.lt.s32.totalorder %s26_s25, %s26_s25 }
   0x3   :  { %p527_p0 = scmp.ne.s32.totalorder %s26_s25, %s526_s26  ;;  %p532_p2 = scmp.lt.s32.totalorder %s526_s26, %s526_s26 }
   0x5   :  { %p533_p3 = por %p532_p2, %p531_p1 }
   0x7   :  { %p534_p4 = pnand %p533_p3, %p527_p0 }
   0x9   :  { %537 = shalt.err (!%p534_p4)
}
   0xa   :  { %s541_s27 = smov 64   ;;  %s542_s28 = smov 4  }
   0xb   :  { %31 = dma.hbm_to_vmem [thread:$0]  %s668_s3, 1024, %s26_s25, [#allocation4], %s541_s27, %s541_s27, %s542_s28  }
   0xc   :  { %538 = dma.done.wait [#allocation4], 1024  }
   0xd   :  { %539 = vsyncadd [#allocation4], 4294966272  ;;  %v543_v0 = vmov 0   ;;  %vm117_vm0 = vcmask 1046528   ;;  %v500_v3 = vld [vmem:[%s666_s1 + $0x14] ss:$8 sps:$4 sm:$0xff]  }
   0xe   :  { %156 = vmatprep.mubr.bf16.mxu0 %v543_v0  ;;  %v497_v1 = vld [vmem:[%s666_s1 + $0x24] ss:$8 sps:$4 sm:$0x7f]   ;;  %v499_v2 = vld [vmem:[%s666_s1 + $0x20] ss:$8 sps:$4 sm:$0x7f]  }
   0xf   :  { %441 = vmatprep.subr.msk.bf16.mxu0 %vm117_vm0, %v497_v1  ;;  %v119_v4 = vsel %vm117_vm0, %v499_v2, 0  ;;  %v502_v5 = vld [vmem:[%s666_s1 + $0x10] ss:$8 sps:$4 sm:$0xff]   ;;  %v503_v6 = vld [vmem:[%s666_s1 + $0x4] ss:$8 sps:$4 sm:$0xff]   ;;  %vm104_vm1 = vcmask 375808  }
  0x10   :  { %135 = vmatpush1.bf16.msra.mxu0 %v119_v4  ;;  %v505_v7 = vld [vmem:[%s666_s1] ss:$8 sps:$4 sm:$0xff]   ;;  %v510_v8 = vld [vmem:[#allocation3 + $0x38] sm:$0xff]   ;;  %v511_v9 = vld [vmem:[#allocation3 + $0x30] sm:$0xff]   ;;  %vm417_vm2 = vcmask 7168  }
  0x11   :  { %136 = vmatprep.subr.bf16.mxu0 %v500_v3  ;;  %v506_v10 = vld [vmem:[%s665_s0] sm:$0xff]   ;;  %469 = vmatprep.subr.bf16.mxu1 %v510_v8  ;;  %v512_v11 = vld [vmem:[#allocation3 + $0x28] sm:$0xff]   ;;  %v508_v14 = vld [vmem:[%s665_s0 + $0x10] sm:$0xff]  }
  0x12   :  { %470 = vmatpush3.bf16.msra.mxu1 %v510_v8  ;;  %v513_v12 = vld [vmem:[#allocation3 + $0x20] sm:$0xff]   ;;  %v507_v13 = vld [vmem:[%s665_s0 + $0x8] sm:$0xff]   ;;  %v509_v15 = vld [vmem:[%s665_s0 + $0x18] sm:$0xff]  }
  0x13   :  { %471 = vmatprep.subr.bf16.mxu1 %v511_v9  ;;  %v514_v16 = vld [vmem:[#allocation3 + $0x18] sm:$0xff]   ;;  %v515_v17 = vld [vmem:[#allocation3 + $0x10] sm:$0xff]   ;;  %v516_v18 = vld [vmem:[#allocation3 + $0x8] sm:$0xff]  }
  0x14   :  { %137 = vmatpush1.bf16.msra.mxu0 %v502_v5  ;;  %v517_v19 = vld [vmem:[#allocation3] sm:$0xff]  }
  0x15   :  { %138 = vmatprep.subr.bf16.mxu0 %v503_v6  ;;  %v446_v21 = vld [vmem:[%s667_s2] ss:$0 sm:$0xff] }
  0x16   :  { %472 = vmatpush3.bf16.msra.mxu1 %v511_v9  ;;  %v455_v57 = vld [vmem:[%s669_s4] ss:$0 sm:$0xff] }
  0x17   :  { %473 = vmatprep.subr.bf16.mxu1 %v512_v11  ;;  %v456_v63 = vld [vmem:[%s670_s5] ss:$0 sm:$0xff] }
  0x18   :  { %139 = vmatpush1.bf16.msra.mxu0 %v505_v7 }
  0x1a   :  { %474 = vmatpush3.bf16.msra.mxu1 %v512_v11 }
  0x1b   :  { %442 = vmatmul.mubr.msk.bf16.vlgmr.msra.gmra.mxu0 %vm104_vm1, %v506_v10  ;;  %475 = vmatprep.subr.bf16.mxu1 %v513_v12 }
  0x1c   :  { %166 = vmatprep.mubr.bf16.mxu0 %v543_v0 }
  0x1e   :  { %476 = vmatpush3.bf16.msra.mxu1 %v513_v12 }
  0x1f   :  { %477 = vmatprep.subr.bf16.mxu1 %v514_v16 }
  0x22   :  { %478 = vmatpush3.bf16.msra.mxu1 %v514_v16 }
  0x23   :  { %443 = vmatmul.mubr.msk.bf16.gmra.mxu0 %vm104_vm1, %v507_v13  ;;  %479 = vmatprep.subr.bf16.mxu1 %v515_v17 }
  0x24   :  { %176 = vmatprep.mubr.bf16.mxu0 %v543_v0 }
  0x26   :  { %480 = vmatpush3.bf16.msra.mxu1 %v515_v17 }
  0x27   :  { %481 = vmatprep.subr.bf16.mxu1 %v516_v18 }
  0x2a   :  { %482 = vmatpush3.bf16.msra.mxu1 %v516_v18 }
  0x2b   :  { %444 = vmatmul.mubr.msk.bf16.gmra.mxu0 %vm104_vm1, %v508_v14  ;;  %483 = vmatprep.subr.bf16.mxu1 %v517_v19 }
  0x2c   :  { %186 = vmatprep.mubr.bf16.mxu0 %v543_v0 }
  0x2e   :  { %484 = vmatpush3.bf16.msra.mxu1 %v517_v19 }
  0x33   :  { %445 = vmatmul.mubr.msk.bf16.gmra.mxu0 %vm104_vm1, %v509_v15 }
  0xdb   :  { %v158_v20 = vpop.f32.mrf.mxu0 }
  0xdc   :  { %v204_v23 = vadd.f32 %v446_v21, %v158_v20 }
  0xdd   :  { %v160_v22 = vpop.f32.mrf.mxu0 }
  0xde   :  { %v212_v27 = vmax.f32 %v204_v23, 0.0 }
  0xdf   :  { %v162_v24 = vpop.f32.mrf.mxu0 }
  0xe0   :  { %v205_v25 = vadd.f32 %v446_v21, %v162_v24 }
  0xe1   :  { %v164_v26 = vpop.f32.mrf.mxu0 }
  0xe2   :  { %v213_v28 = vmax.f32 %v205_v25, 0.0 }
  0xe3   :  { %v168_v29 = vpop.f32.mrf.mxu0 }
  0xe4   :  { %v220_v30 = vpack.c.bf16 %v213_v28, %v212_v27  ;;  %v206_v32 = vadd.f32 %v446_v21, %v168_v29 }
  0xe5   :  { %v170_v31 = vpop.f32.mrf.mxu0 }
  0xe6   :  { %485 = vmatprep.mubr.bf16.mxu1 %v220_v30  ;;  %v214_v36 = vmax.f32 %v206_v32, 0.0 }
  0xe7   :  { %v172_v33 = vpop.f32.mrf.mxu0 }
  0xe8   :  { %v207_v34 = vadd.f32 %v446_v21, %v172_v33 }
  0xe9   :  { %v174_v35 = vpop.f32.mrf.mxu0 }
  0xea   :  { %v215_v37 = vmax.f32 %v207_v34, 0.0 }
  0xeb   :  { %v178_v38 = vpop.f32.mrf.mxu0 }
  0xec   :  { %v221_v39 = vpack.c.bf16 %v215_v37, %v214_v36  ;;  %v208_v41 = vadd.f32 %v446_v21, %v178_v38 }
  0xed   :  { %v180_v40 = vpop.f32.mrf.mxu0 }
  0xee   :  { %486 = vmatmul.mubr.bf16.vlgmr.msra.gmra.mxu1 %v221_v39  ;;  %v216_v45 = vmax.f32 %v208_v41, 0.0 }
  0xef   :  { %v182_v42 = vpop.f32.mrf.mxu0 }
  0xf0   :  { %v209_v43 = vadd.f32 %v446_v21, %v182_v42 }
  0xf1   :  { %v184_v44 = vpop.f32.mrf.mxu0 }
  0xf2   :  { %v217_v46 = vmax.f32 %v209_v43, 0.0 }
  0xf3   :  { %v188_v47 = vpop.f32.mrf.mxu0 }
  0xf4   :  { %v222_v48 = vpack.c.bf16 %v217_v46, %v216_v45  ;;  %v210_v50 = vadd.f32 %v446_v21, %v188_v47 }
  0xf5   :  { %v190_v49 = vpop.f32.mrf.mxu0 }
  0xf6   :  { %489 = vmatprep.mubr.bf16.mxu1 %v222_v48  ;;  %v218_v53 = vmax.f32 %v210_v50, 0.0 }
  0xf7   :  { %v192_v51 = vpop.f32.mrf.mxu0 }
  0xf8   :  { %v211_v52 = vadd.f32 %v446_v21, %v192_v51 }
  0xf9   :  { %v194_v18 = vpop.f32.mrf.mxu0 }
  0xfa   :  { %v219_v54 = vmax.f32 %v211_v52, 0.0 }
  0xfc   :  { %v223_v55 = vpack.c.bf16 %v219_v54, %v218_v53 }
  0xfe   :  { %490 = vmatmul.mubr.bf16.gmra.mxu1 %v223_v55 }
 0x1ae   :  { %v487_v56 = vpop.f32.mrf.mxu1 }
 0x1af   :  { %v331_v58 = vadd.f32 %v487_v56, %v170_v31 }
 0x1b0   :  { %v322_v59 = vpop.f32.mrf.mxu1 }
 0x1b1   :  { %v323_v60 = vadd.f32 %v322_v59, %v160_v22  ;;  %v362_v61 = vadd.f32 %v455_v57, %v331_v58 }
 0x1b2   :  { %v488_v62 = vpop.f32.mrf.mxu1 }
 0x1b3   :  { %v334_v0 = vadd.f32 %v488_v62, %v174_v35  ;;  %v370_v1 = vmax.f32 %v362_v61, 0.0  ;;  %v360_v2 = vadd.f32 %v455_v57, %v323_v60  ;;  %v408_v35 = vstv %s671_s6 }
 0x1b4   :  { %v325_v3 = vpop.f32.mrf.mxu1 }
 0x1b5   :  { %v363_v4 = vadd.f32 %v455_v57, %v334_v0  ;;  %v326_v5 = vadd.f32 %v325_v3, %v164_v26  ;;  %v385_v6 = vmul.f32 %v456_v63, %v370_v1  ;;  %v368_v7 = vmax.f32 %v360_v2, 0.0 }
 0x1b7   :  { %v371_v8 = vmax.f32 %v363_v4, 0.0  ;;  %v361_v9 = vadd.f32 %v455_v57, %v326_v5  ;;  %395 = vadd.xlane.f32.xlu1 %v385_v6  ;;  %v383_v10 = vmul.f32 %v456_v63, %v368_v7 }
 0x1b9   :  { %v369_v11 = vmax.f32 %v361_v9, 0.0  ;;  %391 = vadd.xlane.f32.xlu0 %v383_v10  ;;  %v386_v12 = vmul.f32 %v456_v63, %v371_v8 }
 0x1bb   :  { %397 = vadd.xlane.f32.xlu1 %v386_v12  ;;  %v384_v13 = vmul.f32 %v456_v63, %v369_v11 }
 0x1bd   :  { %393 = vadd.xlane.f32.xlu0 %v384_v13 }
 0x1be   :  { %v491_v14 = vpop.f32.mrf.mxu1 }
 0x1bf   :  { %v347_v15 = vadd.f32 %v491_v14, %v190_v49 }
 0x1c0   :  { %v338_v16 = vpop.f32.mrf.mxu1 }
 0x1c1   :  { %v339_v17 = vadd.f32 %v338_v16, %v180_v40  ;;  %v366_v20 = vadd.f32 %v455_v57, %v347_v15 }
 0x1c2   :  { %v492_v19 = vpop.f32.mrf.mxu1 }
 0x1c3   :  { %v364_v21 = vadd.f32 %v455_v57, %v339_v17  ;;  %v350_v22 = vadd.f32 %v492_v19, %v194_v18  ;;  %v374_v26 = vmax.f32 %v366_v20, 0.0 }
 0x1c4   :  { %v341_v23 = vpop.f32.mrf.mxu1 }
 0x1c5   :  { %v372_v24 = vmax.f32 %v364_v21, 0.0  ;;  %v342_v25 = vadd.f32 %v341_v23, %v184_v44  ;;  %v367_v27 = vadd.f32 %v455_v57, %v350_v22  ;;  %v389_v33 = vmul.f32 %v456_v63, %v374_v26 }
 0x1c7   :  { %v365_v28 = vadd.f32 %v455_v57, %v342_v25  ;;  %v387_v29 = vmul.f32 %v456_v63, %v372_v24  ;;  %v375_v31 = vmax.f32 %v367_v27, 0.0 }
 0x1c9   :  { %v373_v30 = vmax.f32 %v365_v28, 0.0  ;;  %399 = vadd.xlane.f32.xlu0 %v387_v29  ;;  %v390_v34 = vmul.f32 %v456_v63, %v375_v31 }
 0x1cb   :  { %v388_v32 = vmul.f32 %v456_v63, %v373_v30 }
 0x1cd   :  { %401 = vadd.xlane.f32.xlu1 %v388_v32  ;;  %403 = vadd.xlane.f32.xlu0 %v389_v33 }
 0x1d1   :  { %405 = vadd.xlane.f32.xlu1 %v390_v34 }
 0x240   :  { %v396_v36 = vpop.xlane.xlu1 %395 }
 0x241   :  { %v411_v37 = vadd.f32 %v408_v35, %v396_v36 }
 0x242   :  { %v392_v38 = vpop.xlane.xlu0 %391 }
 0x243   :  { %420 = vst.msk [vmem:[%s672_s7 + $0x10] sm:$0xff] %vm417_vm2, %v411_v37  ;;  %v409_v39 = vadd.f32 %v408_v35, %v392_v38 }
 0x244   :  { %v398_v40 = vpop.xlane.xlu1 %397 }
 0x245   :  { %418 = vst.msk [vmem:[%s672_s7] sm:$0xff] %vm417_vm2, %v409_v39  ;;  %v412_v41 = vadd.f32 %v408_v35, %v398_v40 }
 0x246   :  { %v394_v42 = vpop.xlane.xlu0 %393 }
 0x247   :  { %421 = vst.msk [vmem:[%s672_s7 + $0x18] sm:$0xff] %vm417_vm2, %v412_v41  ;;  %v410_v43 = vadd.f32 %v408_v35, %v394_v42 }
 0x249   :  { %419 = vst.msk [vmem:[%s672_s7 + $0x8] sm:$0xff] %vm417_vm2, %v410_v43 }
 0x252   :  { %v400_v44 = vpop.xlane.xlu0 %399 }
 0x253   :  { %v413_v45 = vadd.f32 %v408_v35, %v400_v44 }
 0x255   :  { %422 = vst.msk [vmem:[%s672_s7 + $0x20] sm:$0xff] %vm417_vm2, %v413_v45 }
 0x256   :  { %v402_v46 = vpop.xlane.xlu1 %401  ;;  %v404_v47 = vpop.xlane.xlu0 %403 }
 0x257   :  { %v414_v48 = vadd.f32 %v408_v35, %v402_v46  ;;  %v415_v49 = vadd.f32 %v408_v35, %v404_v47 }
 0x259   :  { %423 = vst.msk [vmem:[%s672_s7 + $0x28] sm:$0xff] %vm417_vm2, %v414_v48  ;;  %424 = vst.msk [vmem:[%s672_s7 + $0x30] sm:$0xff] %vm417_vm2, %v415_v49 }
 0x25a   :  { %v406_v50 = vpop.xlane.xlu1 %405 }
 0x25b   :  { %v416_v51 = vadd.f32 %v408_v35, %v406_v50 }
 0x25d   :  { %425 = vst.msk [vmem:[%s672_s7 + $0x38] sm:$0xff] %vm417_vm2, %v416_v51 }
 0x25e   :  { %430 = vsyncpa [#allocation4], 1 }

</bundles_post_ra>
